<compile_context>
chip_gen: v5e
topology: v5e:2x2
jax: 0.10.0
libtpu: 0.0.40
codegen_flags: <defaults>
</compile_context>

<pallas_src>
import jax
import jax.numpy as jnp
from jax.experimental import pallas as pl
from jax.experimental.pallas import tpu as pltpu


# ---------------------------------------------------------------------------
# Kernel
# ---------------------------------------------------------------------------
def block_kernel(h_ref,
                 w_a_ref, b_a_ref, w_b_ref, b_b_ref,          # fused ActNorm+InvConv (split)
                 w1t_ref, b1_ref, w2t_ref, b2_ref,             # coupling NN layers 1,2
                 w3lt_ref, b3l_ref, w3tt_ref, b3t_ref,         # coupling NN layer 3 (logs / t heads)
                 out_ref, ld_ref):
    d2 = w_a_ref.shape[1]
    h = h_ref[...].astype(jnp.float32)

    # Fused ActNorm + InvConv, already split into the two coupling halves:
    #   h1_pre = (s*h + b) @ W^T[:, :d2],   h2 = (s*h + b) @ W^T[:, d2:]
    h1_pre = jnp.dot(h, w_a_ref[...], preferred_element_type=jnp.float32) + b_a_ref[...]
    h2 = jnp.dot(h, w_b_ref[...], preferred_element_type=jnp.float32) + b_b_ref[...]

    # Coupling NN(h2): Linear -> ReLU -> Linear -> ReLU -> Linear (pre-split heads)
    z = jnp.dot(h2, w1t_ref[...], preferred_element_type=jnp.float32) + b1_ref[...]
    z = jnp.maximum(z, 0.0)
    z = jnp.dot(z, w2t_ref[...], preferred_element_type=jnp.float32) + b2_ref[...]
    z = jnp.maximum(z, 0.0)
    logs = jax.nn.sigmoid(
        jnp.dot(z, w3lt_ref[...], preferred_element_type=jnp.float32) + b3l_ref[...] + 2.0
    ) + 1e-7
    t = jnp.dot(z, w3tt_ref[...], preferred_element_type=jnp.float32) + b3t_ref[...]

    s = jnp.exp(logs)
    out_ref[:, :d2] = (s * h1_pre + t).astype(out_ref.dtype)
    out_ref[:, d2:] = h2.astype(out_ref.dtype)

    # log(|exp(logs)|) == logs (logs > 0), so skip the exp->abs->log round trip.
    # Per-row partials keep the batch axis fully parallel (reduced in the wrapper).
    ld_ref[...] = jnp.sum(logs, axis=1, keepdims=True)


# ---------------------------------------------------------------------------
# Wrapper
# ---------------------------------------------------------------------------
def _pick_tile_n(n, max_tile=512):
    """Largest row tile <= max_tile that divides n and is a multiple of 8."""
    if n <= max_tile:
        return n
    for t in range(max_tile, 7, -1):
        if n % t == 0 and t % 8 == 0:
            return t
    return n  # fallback: single tile covering all rows


def block_forward(h, params, *, tile_n=None):
    N, D = h.shape
    D2 = D // 2
    assert D == 2 * D2, "feature dim must be even"

    # ---- param-only precompute (XLA, once per call -- not per grid tile) ----
    s_an, b_an = params["s_an"], params["b_an"]
    w_inv_t = params["w_inv"].T                      # so the kernel does h @ W^T
    w_eff = s_an.reshape(D, 1) * w_inv_t             # fold ActNorm scale into InvConv
    b_eff = b_an @ w_inv_t                           # fold ActNorm bias
    w_a, w_b = w_eff[:, :D2], w_eff[:, D2:]          # pre-split -> coupling halves
    b_a, b_b = b_eff[:, :D2], b_eff[:, D2:]
    w1_t, w2_t = params["w1"].T, params["w2"].T
    w3_t = params["w3"].T
    w3l_t, w3t_t = w3_t[:, :D2], w3_t[:, D2:]        # logs-head / t-head slabs
    b3l, b3t = params["b3"][:, :D2], params["b3"][:, D2:]

    # Constant (param-only) part of the logdet: ActNorm + InvConv.
    ld_const = (jnp.float32(D) * jnp.sum(jnp.log(jnp.abs(s_an)))
                + jnp.float32(D) * jnp.sum(params["s_param"]))

    if tile_n is None:
        tile_n = _pick_tile_n(N)
    assert N % tile_n == 0, "tile_n must divide the batch"
    grid = (N // tile_n,)

    def full(shape):
        return pl.BlockSpec(shape, lambda i: (0,) * len(shape))

    def rows(width):
        return pl.BlockSpec((tile_n, width), lambda i: (i, 0))

    out_h, ld_rows = pl.pallas_call(
        block_kernel,
        grid=grid,
        in_specs=[
            rows(D),
            full((D, D2)), full((1, D2)), full((D, D2)), full((1, D2)),
            full((D2, D2)), full((1, D2)), full((D2, D2)), full((1, D2)),
            full((D2, D2)), full((1, D2)), full((D2, D2)), full((1, D2)),
        ],
        out_specs=(rows(D), rows(1)),
        out_shape=(jax.ShapeDtypeStruct((N, D), jnp.float32),
                   jax.ShapeDtypeStruct((N, 1), jnp.float32)),
        compiler_params=pltpu.CompilerParams(
            dimension_semantics=("parallel",),
            vmem_limit_bytes=32 * 1024 * 1024,
        ),
    )(h, w_a, b_a, w_b, b_b, w1_t, params["b1"], w2_t, params["b2"],
      w3l_t, b3l, w3t_t, b3t)

    return out_h, ld_const + jnp.sum(ld_rows)


# ---------------------------------------------------------------------------
# Parameter construction (plain-JAX glue; QR / LU run at init time only)
# ---------------------------------------------------------------------------
def make_params(key, dim):
    d2 = dim // 2
    keys = jax.random.split(key, 8)

    # ActNorm parameters (module init is ones/zeros; random so logdet is exercised).
    s_an = 0.5 + jax.random.uniform(keys[0], (1, dim), jnp.float32)
    b_an = 0.1 * jax.random.normal(keys[1], (1, dim), jnp.float32)

    # InvConv: W = P @ (L*L_mask + I) @ (U*U_mask + diag(sign(S)*exp(S_param)))
    w0 = jax.random.normal(keys[2], (dim, dim), jnp.float32)
    q, _ = jnp.linalg.qr(w0)
    p_mat, l_mat, u_mat = jax.scipy.linalg.lu(q)
    s_diag = jnp.diag(u_mat)
    u_upper = jnp.triu(u_mat, 1)
    u_mask = jnp.triu(jnp.ones_like(u_mat), 1)
    l_mask = u_mask.T
    l_eye = jnp.eye(dim, dtype=jnp.float32)
    s_sign = jnp.sign(s_diag)
    s_param = jnp.log(1e-7 + jnp.abs(s_diag))
    w_inv = p_mat @ (l_mat * l_mask + l_eye) @ (u_upper * u_mask +
                                                jnp.diag(s_sign * jnp.exp(s_param)))

    # Coupling NN: Linear(d2,d2) -> ReLU -> Linear(d2,d2) -> ReLU -> Linear(d2,2*d2)
    w1 = 0.3 * jax.random.normal(keys[3], (d2, d2), jnp.float32)
    b1 = 0.1 * jax.random.normal(keys[4], (1, d2), jnp.float32)
    w2 = 0.3 * jax.random.normal(keys[5], (d2, d2), jnp.float32)
    b2 = 0.1 * jax.random.normal(keys[6], (1, d2), jnp.float32)
    w3 = 0.3 * jax.random.normal(keys[7], (dim, d2), jnp.float32)
    b3 = jnp.zeros((1, dim), jnp.float32)

    return dict(s_an=s_an, b_an=b_an, w_inv=w_inv,
                s_param=s_param.reshape(1, dim),
                w1=w1, b1=b1, w2=w2, b2=b2, w3=w3, b3=b3)


def block_forward_ref(h, params):
    """Pure-JAX reference mirroring the PyTorch forward."""
    D = h.shape[1]
    D2 = D // 2
    # ActNorm
    h = params["s_an"] * h + params["b_an"]
    logdet = D * jnp.sum(jnp.log(jnp.abs(params["s_an"])))
    # InvConv
    h = (params["w_inv"] @ h.T).T
    logdet = logdet + D * jnp.sum(params["s_param"])
    # AffineCoupling
    h1, h2 = h[:, :D2], h[:, D2:]
    z = jnp.maximum(h2 @ params["w1"].T + params["b1"], 0.0)
    z = jnp.maximum(z @ params["w2"].T + params["b2"], 0.0)
    z = z @ params["w3"].T + params["b3"]
    logs = jax.nn.sigmoid(z[:, :D2] + 2.0) + 1e-7
    t = z[:, D2:]
    s = jnp.exp(logs)
    h1 = s * h1 + t
    logdet = logdet + jnp.sum(jnp.log(jnp.abs(s)))
    return jnp.concatenate([h1, h2], axis=1), logdet


if __name__ == "__main__":
    key = jax.random.PRNGKey(0)
    k_h, k_p = jax.random.split(key)

    batch, dim = 256, 32          # small shapes; tile_n=64 -> 4-step parallel grid
    h = jax.random.normal(k_h, (batch, dim), jnp.float32)
    params = make_params(k_p, dim)

    out_h, out_ld = block_forward(h, params, tile_n=64)
    out_h = jax.block_until_ready(out_h)
    out_ld = jax.block_until_ready(out_ld)

    ref_h, ref_ld = block_forward_ref(h, params)
    # Folding ActNorm into the InvConv matmul reassociates FP ops -> slightly
    # looser tolerance than bit-exact.
    assert jnp.allclose(out_h, ref_h, rtol=1e-4, atol=1e-4), "h mismatch"
    assert jnp.allclose(out_ld, ref_ld, rtol=1e-4, atol=1e-4), "logdet mismatch"

    print("KERNEL_OK")
</pallas_src>

<mosaic_0001>
module attributes {stable_mosaic.version = 11 : i64} {
  func.func @block_kernel(%arg0: i32, %arg1: memref<64x32xf32, #tpu.memory_space<vmem>>, %arg2: memref<32x16xf32, #tpu.memory_space<vmem>>, %arg3: memref<1x16xf32, #tpu.memory_space<vmem>>, %arg4: memref<32x16xf32, #tpu.memory_space<vmem>>, %arg5: memref<1x16xf32, #tpu.memory_space<vmem>>, %arg6: memref<16x16xf32, #tpu.memory_space<vmem>>, %arg7: memref<1x16xf32, #tpu.memory_space<vmem>>, %arg8: memref<16x16xf32, #tpu.memory_space<vmem>>, %arg9: memref<1x16xf32, #tpu.memory_space<vmem>>, %arg10: memref<16x16xf32, #tpu.memory_space<vmem>>, %arg11: memref<1x16xf32, #tpu.memory_space<vmem>>, %arg12: memref<16x16xf32, #tpu.memory_space<vmem>>, %arg13: memref<1x16xf32, #tpu.memory_space<vmem>>, %arg14: memref<64x32xf32, #tpu.memory_space<vmem>>, %arg15: memref<64x1xf32, #tpu.memory_space<vmem>>) attributes {dimension_semantics = [#tpu.dimension_semantics<parallel>], iteration_bounds = array<i64: 4>, scalar_prefetch = 0 : i64, scratch_operands = 0 : i64, tpu.core_type = #tpu.core_type<tc>, window_params = [{transform_indices = @transform_0, window_bounds = array<i64: 64, 32>}, {pipeline_mode = #tpu.pipeline_mode<synchronous>, transform_indices = @transform_1, window_bounds = array<i64: 32, 16>}, {pipeline_mode = #tpu.pipeline_mode<synchronous>, transform_indices = @transform_2, window_bounds = array<i64: 1, 16>}, {pipeline_mode = #tpu.pipeline_mode<synchronous>, transform_indices = @transform_3, window_bounds = array<i64: 32, 16>}, {pipeline_mode = #tpu.pipeline_mode<synchronous>, transform_indices = @transform_4, window_bounds = array<i64: 1, 16>}, {pipeline_mode = #tpu.pipeline_mode<synchronous>, transform_indices = @transform_5, window_bounds = array<i64: 16, 16>}, {pipeline_mode = #tpu.pipeline_mode<synchronous>, transform_indices = @transform_6, window_bounds = array<i64: 1, 16>}, {pipeline_mode = #tpu.pipeline_mode<synchronous>, transform_indices = @transform_7, window_bounds = array<i64: 16, 16>}, {pipeline_mode = #tpu.pipeline_mode<synchronous>, transform_indices = @transform_8, window_bounds = array<i64: 1, 16>}, {pipeline_mode = #tpu.pipeline_mode<synchronous>, transform_indices = @transform_9, window_bounds = array<i64: 16, 16>}, {pipeline_mode = #tpu.pipeline_mode<synchronous>, transform_indices = @transform_10, window_bounds = array<i64: 1, 16>}, {pipeline_mode = #tpu.pipeline_mode<synchronous>, transform_indices = @transform_11, window_bounds = array<i64: 16, 16>}, {pipeline_mode = #tpu.pipeline_mode<synchronous>, transform_indices = @transform_12, window_bounds = array<i64: 1, 16>}, {transform_indices = @transform_13, window_bounds = array<i64: 64, 32>}, {transform_indices = @transform_14, window_bounds = array<i64: 64, 1>}]} {
    %c0 = arith.constant 0 : index
    %c0_0 = arith.constant 0 : index
    %0 = vector.load %arg1[%c0, %c0_0] : memref<64x32xf32, #tpu.memory_space<vmem>>, vector<64x32xf32>
    %c0_1 = arith.constant 0 : index
    %c0_2 = arith.constant 0 : index
    %1 = vector.load %arg2[%c0_1, %c0_2] : memref<32x16xf32, #tpu.memory_space<vmem>>, vector<32x16xf32>
    %cst = arith.constant dense<0.000000e+00> : vector<64x16xf32>
    %2 = tpu.matmul %0, %1, %cst {dimension_numbers = #tpu.dot_dimension_numbers<[1], [0], [0], [1], [0, 0, 1, 1], [], []>} : vector<64x32xf32>, vector<32x16xf32>, vector<64x16xf32> -> vector<64x16xf32>
    %c0_3 = arith.constant 0 : index
    %c0_4 = arith.constant 0 : index
    %3 = vector.load %arg3[%c0_3, %c0_4] : memref<1x16xf32, #tpu.memory_space<vmem>>, vector<1x16xf32>
    %4 = vector.broadcast %3 : vector<1x16xf32> to vector<64x16xf32>
    %5 = arith.addf %2, %4 : vector<64x16xf32>
    %c0_5 = arith.constant 0 : index
    %c0_6 = arith.constant 0 : index
    %6 = vector.load %arg4[%c0_5, %c0_6] : memref<32x16xf32, #tpu.memory_space<vmem>>, vector<32x16xf32>
    %cst_7 = arith.constant dense<0.000000e+00> : vector<64x16xf32>
    %7 = tpu.matmul %0, %6, %cst_7 {dimension_numbers = #tpu.dot_dimension_numbers<[1], [0], [0], [1], [0, 0, 1, 1], [], []>} : vector<64x32xf32>, vector<32x16xf32>, vector<64x16xf32> -> vector<64x16xf32>
    %c0_8 = arith.constant 0 : index
    %c0_9 = arith.constant 0 : index
    %8 = vector.load %arg5[%c0_8, %c0_9] : memref<1x16xf32, #tpu.memory_space<vmem>>, vector<1x16xf32>
    %9 = vector.broadcast %8 : vector<1x16xf32> to vector<64x16xf32>
    %10 = arith.addf %7, %9 : vector<64x16xf32>
    %c0_10 = arith.constant 0 : index
    %c0_11 = arith.constant 0 : index
    %11 = vector.load %arg6[%c0_10, %c0_11] : memref<16x16xf32, #tpu.memory_space<vmem>>, vector<16x16xf32>
    %cst_12 = arith.constant dense<0.000000e+00> : vector<64x16xf32>
    %12 = tpu.matmul %10, %11, %cst_12 {dimension_numbers = #tpu.dot_dimension_numbers<[1], [0], [0], [1], [0, 0, 1, 1], [], []>} : vector<64x16xf32>, vector<16x16xf32>, vector<64x16xf32> -> vector<64x16xf32>
    %c0_13 = arith.constant 0 : index
    %c0_14 = arith.constant 0 : index
    %13 = vector.load %arg7[%c0_13, %c0_14] : memref<1x16xf32, #tpu.memory_space<vmem>>, vector<1x16xf32>
    %14 = vector.broadcast %13 : vector<1x16xf32> to vector<64x16xf32>
    %15 = arith.addf %12, %14 : vector<64x16xf32>
    %cst_15 = arith.constant 0.000000e+00 : f32
    %16 = vector.broadcast %cst_15 : f32 to vector<64x16xf32>
    %17 = arith.maximumf %15, %16 : vector<64x16xf32>
    %c0_16 = arith.constant 0 : index
    %c0_17 = arith.constant 0 : index
    %18 = vector.load %arg8[%c0_16, %c0_17] : memref<16x16xf32, #tpu.memory_space<vmem>>, vector<16x16xf32>
    %cst_18 = arith.constant dense<0.000000e+00> : vector<64x16xf32>
    %19 = tpu.matmul %17, %18, %cst_18 {dimension_numbers = #tpu.dot_dimension_numbers<[1], [0], [0], [1], [0, 0, 1, 1], [], []>} : vector<64x16xf32>, vector<16x16xf32>, vector<64x16xf32> -> vector<64x16xf32>
    %c0_19 = arith.constant 0 : index
    %c0_20 = arith.constant 0 : index
    %20 = vector.load %arg9[%c0_19, %c0_20] : memref<1x16xf32, #tpu.memory_space<vmem>>, vector<1x16xf32>
    %21 = vector.broadcast %20 : vector<1x16xf32> to vector<64x16xf32>
    %22 = arith.addf %19, %21 : vector<64x16xf32>
    %cst_21 = arith.constant 0.000000e+00 : f32
    %23 = vector.broadcast %cst_21 : f32 to vector<64x16xf32>
    %24 = arith.maximumf %22, %23 : vector<64x16xf32>
    %c0_22 = arith.constant 0 : index
    %c0_23 = arith.constant 0 : index
    %25 = vector.load %arg10[%c0_22, %c0_23] : memref<16x16xf32, #tpu.memory_space<vmem>>, vector<16x16xf32>
    %cst_24 = arith.constant dense<0.000000e+00> : vector<64x16xf32>
    %26 = tpu.matmul %24, %25, %cst_24 {dimension_numbers = #tpu.dot_dimension_numbers<[1], [0], [0], [1], [0, 0, 1, 1], [], []>} : vector<64x16xf32>, vector<16x16xf32>, vector<64x16xf32> -> vector<64x16xf32>
    %c0_25 = arith.constant 0 : index
    %c0_26 = arith.constant 0 : index
    %27 = vector.load %arg11[%c0_25, %c0_26] : memref<1x16xf32, #tpu.memory_space<vmem>>, vector<1x16xf32>
    %28 = vector.broadcast %27 : vector<1x16xf32> to vector<64x16xf32>
    %29 = arith.addf %26, %28 : vector<64x16xf32>
    %cst_27 = arith.constant 2.000000e+00 : f32
    %30 = vector.broadcast %cst_27 : f32 to vector<64x16xf32>
    %31 = arith.addf %29, %30 : vector<64x16xf32>
    %32 = arith.negf %31 : vector<64x16xf32>
    %33 = math.exp %32 : vector<64x16xf32>
    %cst_28 = arith.constant 1.000000e+00 : f32
    %34 = vector.broadcast %cst_28 : f32 to vector<64x16xf32>
    %35 = arith.addf %34, %33 : vector<64x16xf32>
    %36 = arith.divf %34, %35 : vector<64x16xf32>
    %cst_29 = arith.constant 1.000000e-07 : f32
    %37 = vector.broadcast %cst_29 : f32 to vector<64x16xf32>
    %38 = arith.addf %36, %37 : vector<64x16xf32>
    %c0_30 = arith.constant 0 : index
    %c0_31 = arith.constant 0 : index
    %39 = vector.load %arg12[%c0_30, %c0_31] : memref<16x16xf32, #tpu.memory_space<vmem>>, vector<16x16xf32>
    %cst_32 = arith.constant dense<0.000000e+00> : vector<64x16xf32>
    %40 = tpu.matmul %24, %39, %cst_32 {dimension_numbers = #tpu.dot_dimension_numbers<[1], [0], [0], [1], [0, 0, 1, 1], [], []>} : vector<64x16xf32>, vector<16x16xf32>, vector<64x16xf32> -> vector<64x16xf32>
    %c0_33 = arith.constant 0 : index
    %c0_34 = arith.constant 0 : index
    %41 = vector.load %arg13[%c0_33, %c0_34] : memref<1x16xf32, #tpu.memory_space<vmem>>, vector<1x16xf32>
    %42 = vector.broadcast %41 : vector<1x16xf32> to vector<64x16xf32>
    %43 = arith.addf %40, %42 : vector<64x16xf32>
    %44 = math.exp %38 : vector<64x16xf32>
    %45 = arith.mulf %44, %5 : vector<64x16xf32>
    %46 = arith.addf %45, %43 : vector<64x16xf32>
    %c0_35 = arith.constant 0 : index
    %c0_36 = arith.constant 0 : index
    %47 = vector.load %arg14[%c0_35, %c0_36] : memref<64x32xf32, #tpu.memory_space<vmem>>, vector<64x16xf32>
    tpu.vector_store %arg14[%c0_35, %c0_36], %46 {strides = array<i32>} : memref<64x32xf32, #tpu.memory_space<vmem>>, vector<64x16xf32>,
    %c0_37 = arith.constant 0 : index
    %c16 = arith.constant 16 : index
    %48 = vector.load %arg14[%c0_37, %c16] : memref<64x32xf32, #tpu.memory_space<vmem>>, vector<64x16xf32>
    tpu.vector_store %arg14[%c0_37, %c16], %10 {strides = array<i32>} : memref<64x32xf32, #tpu.memory_space<vmem>>, vector<64x16xf32>,
    %cst_38 = arith.constant dense<0.000000e+00> : vector<64xf32>
    %49 = vector.multi_reduction <add>, %38, %cst_38 [1] : vector<64x16xf32> to vector<64xf32>
    %50 = vector.shape_cast %49 : vector<64xf32> to vector<64x1xf32>
    %c0_39 = arith.constant 0 : index
    %c0_40 = arith.constant 0 : index
    %51 = vector.load %arg15[%c0_39, %c0_40] : memref<64x1xf32, #tpu.memory_space<vmem>>, vector<64x1xf32>
    tpu.vector_store %arg15[%c0_39, %c0_40], %50 {strides = array<i32>} : memref<64x1xf32, #tpu.memory_space<vmem>>, vector<64x1xf32>,
    return
  }
  func.func @transform_0(%arg0: i32) -> (i32, i32) {
    %c0_i32 = arith.constant 0 : i32
    %c0_i32_0 = arith.constant 0 : i32
    return %arg0, %c0_i32 : i32, i32
  }
  func.func @transform_1(%arg0: i32) -> (i32, i32) {
    %c0_i32 = arith.constant 0 : i32
    %c0_i32_0 = arith.constant 0 : i32
    %c0_i32_1 = arith.constant 0 : i32
    return %c0_i32, %c0_i32_0 : i32, i32
  }
  func.func @transform_2(%arg0: i32) -> (i32, i32) {
    %c0_i32 = arith.constant 0 : i32
    %c0_i32_0 = arith.constant 0 : i32
    %c0_i32_1 = arith.constant 0 : i32
    return %c0_i32, %c0_i32_0 : i32, i32
  }
  func.func @transform_3(%arg0: i32) -> (i32, i32) {
    %c0_i32 = arith.constant 0 : i32
    %c0_i32_0 = arith.constant 0 : i32
    %c0_i32_1 = arith.constant 0 : i32
    return %c0_i32, %c0_i32_0 : i32, i32
  }
  func.func @transform_4(%arg0: i32) -> (i32, i32) {
    %c0_i32 = arith.constant 0 : i32
    %c0_i32_0 = arith.constant 0 : i32
    %c0_i32_1 = arith.constant 0 : i32
    return %c0_i32, %c0_i32_0 : i32, i32
  }
  func.func @transform_5(%arg0: i32) -> (i32, i32) {
    %c0_i32 = arith.constant 0 : i32
    %c0_i32_0 = arith.constant 0 : i32
    %c0_i32_1 = arith.constant 0 : i32
    return %c0_i32, %c0_i32_0 : i32, i32
  }
  func.func @transform_6(%arg0: i32) -> (i32, i32) {
    %c0_i32 = arith.constant 0 : i32
    %c0_i32_0 = arith.constant 0 : i32
    %c0_i32_1 = arith.constant 0 : i32
    return %c0_i32, %c0_i32_0 : i32, i32
  }
  func.func @transform_7(%arg0: i32) -> (i32, i32) {
    %c0_i32 = arith.constant 0 : i32
    %c0_i32_0 = arith.constant 0 : i32
    %c0_i32_1 = arith.constant 0 : i32
    return %c0_i32, %c0_i32_0 : i32, i32
  }
  func.func @transform_8(%arg0: i32) -> (i32, i32) {
    %c0_i32 = arith.constant 0 : i32
    %c0_i32_0 = arith.constant 0 : i32
    %c0_i32_1 = arith.constant 0 : i32
    return %c0_i32, %c0_i32_0 : i32, i32
  }
  func.func @transform_9(%arg0: i32) -> (i32, i32) {
    %c0_i32 = arith.constant 0 : i32
    %c0_i32_0 = arith.constant 0 : i32
    %c0_i32_1 = arith.constant 0 : i32
    return %c0_i32, %c0_i32_0 : i32, i32
  }
  func.func @transform_10(%arg0: i32) -> (i32, i32) {
    %c0_i32 = arith.constant 0 : i32
    %c0_i32_0 = arith.constant 0 : i32
    %c0_i32_1 = arith.constant 0 : i32
    return %c0_i32, %c0_i32_0 : i32, i32
  }
  func.func @transform_11(%arg0: i32) -> (i32, i32) {
    %c0_i32 = arith.constant 0 : i32
    %c0_i32_0 = arith.constant 0 : i32
    %c0_i32_1 = arith.constant 0 : i32
    return %c0_i32, %c0_i32_0 : i32, i32
  }
  func.func @transform_12(%arg0: i32) -> (i32, i32) {
    %c0_i32 = arith.constant 0 : i32
    %c0_i32_0 = arith.constant 0 : i32
    %c0_i32_1 = arith.constant 0 : i32
    return %c0_i32, %c0_i32_0 : i32, i32
  }
  func.func @transform_13(%arg0: i32) -> (i32, i32) {
    %c0_i32 = arith.constant 0 : i32
    %c0_i32_0 = arith.constant 0 : i32
    return %arg0, %c0_i32 : i32, i32
  }
  func.func @transform_14(%arg0: i32) -> (i32, i32) {
    %c0_i32 = arith.constant 0 : i32
    %c0_i32_0 = arith.constant 0 : i32
    return %arg0, %c0_i32 : i32, i32
  }
}

</mosaic_0001>

<bundles_post_ra>
// kernel: tpu_custom_call.1
= control target key start
LH: loop header
LB: loop body
LE: loop exit
PB: predicated region body
PF: predicated region fallthrough
CT: control target
= control target key end

     0   :  { %s1477_s29 = smov 0   ;;  %s1743_s0 = inlined_call_operand.vmem [shape: f32[256,32], index: 0, kind: input, shape index: {}]   ;;  %s1744_s1 = inlined_call_operand.vmem [shape: f32[32,16], index: 1, kind: input, shape index: {}]   ;;  %s1745_s2 = inlined_call_operand.vmem [shape: f32[1,16], index: 2, kind: input, shape index: {}]   ;;  %s1746_s3 = inlined_call_operand.vmem [shape: f32[32,16], index: 3, kind: input, shape index: {}]   ;;  %s1747_s4 = inlined_call_operand.vmem [shape: f32[1,16], index: 4, kind: input, shape index: {}]   ;;  %s1748_s5 = inlined_call_operand.vmem [shape: f32[16,16], index: 5, kind: input, shape index: {}]   ;;  %s1749_s6 = inlined_call_operand.vmem [shape: f32[1,16], index: 6, kind: input, shape index: {}]   ;;  %s1750_s7 = inlined_call_operand.vmem [shape: f32[16,16], index: 7, kind: input, shape index: {}]   ;;  %s1751_s8 = inlined_call_operand.vmem [shape: f32[1,16], index: 8, kind: input, shape index: {}]   ;;  %s1752_s9 = inlined_call_operand.vmem [shape: f32[16,16], index: 9, kind: input, shape index: {}]   ;;  %s1753_s10 = inlined_call_operand.vmem [shape: f32[1,16], index: 10, kind: input, shape index: {}]   ;;  %s1754_s11 = inlined_call_operand.vmem [shape: f32[16,16], index: 11, kind: input, shape index: {}]   ;;  %s1755_s12 = inlined_call_operand.vmem [shape: f32[1,16], index: 12, kind: input, shape index: {}]   ;;  %s1756_s13 = inlined_call_operand.vmem [shape: f32[256,32], index: 13, kind: output, shape index: {0}]   ;;  %s1757_s14 = inlined_call_operand.vmem [shape: f32[256,1], index: 14, kind: output, shape index: {1}]  }
   0x1 LB: > { %s1257_s30 = sadd.s32 4294967295, %s1399_s29   ;;  %p1261_p0 = scmp.ge.s32.totalorder %s1399_s29, 1  ;;  %s1399_s29 = sphi %s1477_s29, %s25_s29  }
   0x2   : > { %p416_p1 = scmp.lt.s32.totalorder %s1399_s29, 5 }
   0x4   : > { %p417_p2 = pnand %p1261_p0, %p416_p1 }
   0x5   : > { %s1262_s19 = sshll.u32 (!%p417_p2), %s1257_s30, 3 }
   0x6   : > { %420 = sbr.rel (%p417_p2) target bundleno = 759 (0x2f7), region = 72  ;;  %p468_p3 = scmp.lt.s32.totalorder (!%p417_p2), %s1262_s19, 31 }
   0xb   : > { %v570_v0 = vld [vmem:[%s1746_s3 + $0x18] sm:$0xff]  ;;  %v569_v1 = vld [vmem:[%s1746_s3 + $0x10] sm:$0xff]  ;;  %v568_v2 = vld [vmem:[%s1746_s3 + $0x8] sm:$0xff]  ;;  %s1759_s19 = smov (!%p468_p3, %s1262_s19), 31  ;;  %vm501_vm0 = vcmask 261120   ;;  %vm622_vm1 = vcmask 130048  }
   0xc   : > { %587 = vmatpush.msra.mxu1 %v570_v0  ;;  %v567_v3 = vld [vmem:[%s1746_s3] sm:$0xff]  ;;  %s1497_s24 = sshll.u32 %s1759_s19, 3  ;;  %v496_v8 = vld [vmem:[%s1744_s1 + $0x18] sm:$0xff]  ;;  %v495_v9 = vld [vmem:[%s1744_s1 + $0x10] sm:$0xff]  ;;  %vm1125_vm12 = vcmask 261248  }
   0xd   : > { %s1503_s27 = scalar_lea.vmem %s1743_s0, %s1497_s24  ;;  %538 = vmatpush.msra.mxu0 %v496_v8  ;;  %v617_v10 = vld [vmem:[%s1748_s5 + $0x8] sm:$0xff]  ;;  %v493_v12 = vld [vmem:[%s1744_s1] sm:$0xff]  ;;  %s1661_s26 = scalar_lea.vmem %s1756_s13, %s1497_s24 }
   0xe   : > { %588 = vmatpush.msra.mxu1 %v569_v1  ;;  %v485_v4 = vld [vmem:[%s1503_s27] sm:$0xff]  ;;  %v486_v5 = vld [vmem:[%s1503_s27 + $0x8] sm:$0xff]  ;;  %v487_v6 = vld [vmem:[%s1503_s27 + $0x10] sm:$0xff]  ;;  %1326 = vmatpush.msra.mxu2 %v617_v10  ;;  %s483_s15 = scalar_lea.vmem %s1757_s14, %s1497_s24 }
   0xf   : > { %v488_v7 = vld [vmem:[%s1503_s27 + $0x18] sm:$0xff]  ;;  %v494_v11 = vld [vmem:[%s1744_s1 + $0x8] sm:$0xff]  ;;  %539 = vmatpush.msra.mxu0 %v495_v9  ;;  %v489_v13 = vld [vmem:[%s1503_s27 + $0x20] sm:$0xff] }
  0x10   : > { %589 = vmatpush.msra.mxu1 %v568_v2  ;;  %v490_v14 = vld [vmem:[%s1503_s27 + $0x28] sm:$0xff]  ;;  %v616_v15 = vld [vmem:[%s1748_s5] sm:$0xff]  ;;  %v491_v16 = vld [vmem:[%s1503_s27 + $0x30] sm:$0xff] }
  0x11   : > { %540 = vmatpush.msra.mxu0 %v494_v11  ;;  %1327 = vmatpush.msra.mxu2 %v616_v15  ;;  %v492_v17 = vld [vmem:[%s1503_s27 + $0x38] sm:$0xff]  ;;  %v1339_v18 = vld [vmem:[%s1747_s4] ss:$0 sm:$0xff]  ;;  %s1401_s27 = smov 16   ;;  %v697_v27 = vld [vmem:[%s1750_s7 + $0x8] sm:$0xff] }
  0x12   : > { %590 = vmatpush.msra.mxu1 %v567_v3  ;;  %1328 = vmatpush.msra.mxu3 %v697_v27  ;;  %v696_v37 = vld [vmem:[%s1750_s7] sm:$0xff]  ;;  %v776_v60 = vld [vmem:[%s1752_s9 + $0x8] sm:$0xff] }
  0x13   : > { %1276 = vmatmul.msk.f32.vlgmr.msra.gmra.mxu1 %vm501_vm0, %v485_v4  ;;  %541 = vmatpush.msra.mxu0 %v493_v12  ;;  %v1591_v44 = vld [vmem:[%s1745_s2] ss:$0 sm:$0xff] }
  0x14   : > { %1268 = vmatmul.msk.f32.vlgmr.msra.gmra.mxu0 %vm501_vm0, %v485_v4  ;;  %740 = vmatpush.msrb.mxu1 %v697_v27  ;;  %v1341_v47 = vld [vmem:[%s1749_s6] ss:$0 sm:$0xff] }
  0x15   : > { %661 = vmatpush.msrb.mxu0 %v617_v10  ;;  %1329 = vmatpush.msra.mxu3 %v696_v37  ;;  %v775_v61 = vld [vmem:[%s1752_s9] sm:$0xff]  ;;  %v1015_v10 = vld [vmem:[%s1754_s11 + $0x8] sm:$0xff] }
  0x16   : > { %741 = vmatpush.msrb.mxu1 %v696_v37  ;;  %819 = vmatpush.msrb.mxu2 %v776_v60  ;;  %v1014_v11 = vld [vmem:[%s1754_s11] sm:$0xff] }
  0x17   : > { %662 = vmatpush.msrb.mxu0 %v616_v15  ;;  %1034 = vmatpush.msrb.mxu3 %v1015_v10  ;;  %v1342_v12 = vld [vmem:[%s1751_s8] ss:$0 sm:$0xff] }
  0x18   : > { %820 = vmatpush.msrb.mxu2 %v775_v61 }
  0x19   : > { %1035 = vmatpush.msrb.mxu3 %v1014_v11 }
  0x1b   : > { %1277 = vmatmul.msk.f32.gmra.mxu1 %vm501_vm0, %v486_v5 }
  0x1c   : > { %1269 = vmatmul.msk.f32.gmra.mxu0 %vm501_vm0, %v486_v5 }
  0x23   : > { %1278 = vmatmul.msk.f32.gmra.mxu1 %vm501_vm0, %v487_v6 }
  0x24   : > { %1270 = vmatmul.msk.f32.gmra.mxu0 %vm501_vm0, %v487_v6 }
  0x2b   : > { %1279 = vmatmul.msk.f32.gmra.mxu1 %vm501_vm0, %v488_v7 }
  0x2c   : > { %1271 = vmatmul.msk.f32.gmra.mxu0 %vm501_vm0, %v488_v7 }
  0x33   : > { %1280 = vmatmul.msk.f32.gmra.mxu1 %vm501_vm0, %v489_v13 }
  0x34   : > { %1272 = vmatmul.msk.f32.gmra.mxu0 %vm501_vm0, %v489_v13 }
  0x3b   : > { %1281 = vmatmul.msk.f32.gmra.mxu1 %vm501_vm0, %v490_v14 }
  0x3c   : > { %1273 = vmatmul.msk.f32.gmra.mxu0 %vm501_vm0, %v490_v14 }
  0x43   : > { %1282 = vmatmul.msk.f32.gmra.mxu1 %vm501_vm0, %v491_v16 }
  0x44   : > { %1274 = vmatmul.msk.f32.gmra.mxu0 %vm501_vm0, %v491_v16 }
  0x4b   : > { %1283 = vmatmul.msk.f32.gmra.mxu1 %vm501_vm0, %v492_v17 }
  0x4c   : > { %1275 = vmatmul.msk.f32.gmra.mxu0 %vm501_vm0, %v492_v17 }
  0x90   : > { %v592_v19 = vpop.f32.mrf.mxu1 }
  0x91   : > { %v593_v20 = vadd.f32 %v1339_v18, %v592_v19  ;;  %v1561_v29 = vpop.f32.mrf.mxu0 }
  0x93   : > { %1101 = vrot.lane.b32.xlu0 %v593_v20, %s1401_s27  ;;  %1284 = vmatmul.msk.f32.vlgmr.msrb.gmra.mxu0 %vm622_vm1, %v593_v20 }
  0x98   : > { %v595_v21 = vpop.f32.mrf.mxu1 }
  0x99   : > { %v596_v22 = vadd.f32 %v1339_v18, %v595_v21  ;;  %v1565_v32 = vpop.f32.mrf.mxu0 }
  0x9b   : > { %1103 = vrot.lane.b32.xlu0 %v596_v22, %s1401_s27  ;;  %1285 = vmatmul.msk.f32.gmra.mxu0 %vm622_vm1, %v596_v22 }
  0xa0   : > { %v598_v23 = vpop.f32.mrf.mxu1 }
  0xa1   : > { %v599_v24 = vadd.f32 %v1339_v18, %v598_v23  ;;  %v1569_v35 = vpop.f32.mrf.mxu0 }
  0xa3   : > { %1105 = vrot.lane.b32.xlu1 %v599_v24, %s1401_s27  ;;  %1286 = vmatmul.msk.f32.gmra.mxu0 %vm622_vm1, %v599_v24 }
  0xa8   : > { %v601_v25 = vpop.f32.mrf.mxu1 }
  0xa9   : > { %v602_v26 = vadd.f32 %v1339_v18, %v601_v25  ;;  %v1576_v39 = vpop.f32.mrf.mxu0 }
  0xab   : > { %1287 = vmatmul.msk.f32.vlgmr.msra.gmra.mxu2 %vm622_vm1, %v602_v26  ;;  %1107 = vrot.lane.b32.xlu1 %v602_v26, %s1401_s27 }
  0xb0   : > { %v604_v28 = vpop.f32.mrf.mxu1 }
  0xb1   : > { %v605_v30 = vadd.f32 %v1339_v18, %v604_v28  ;;  %v1582_v41 = vpop.f32.mrf.mxu0 }
  0xb3   : > { %1109 = vrot.lane.b32.xlu2 %v605_v30, %s1401_s27  ;;  %1288 = vmatmul.msk.f32.gmra.mxu2 %vm622_vm1, %v605_v30 }
  0xb8   : > { %v607_v31 = vpop.f32.mrf.mxu1 }
  0xb9   : > { %v608_v33 = vadd.f32 %v1339_v18, %v607_v31  ;;  %v1584_v42 = vpop.f32.mrf.mxu0 }
  0xbb   : > { %1111 = vrot.lane.b32.xlu2 %v608_v33, %s1401_s27  ;;  %1289 = vmatmul.msk.f32.gmra.mxu2 %vm622_vm1, %v608_v33 }
  0xc0   : > { %v610_v34 = vpop.f32.mrf.mxu1 }
  0xc1   : > { %v611_v36 = vadd.f32 %v1339_v18, %v610_v34  ;;  %v1586_v43 = vpop.f32.mrf.mxu0 }
  0xc3   : > { %1290 = vmatmul.msk.f32.gmra.mxu2 %vm622_vm1, %v611_v36  ;;  %1113 = vrot.lane.b32.xlu0 %v611_v36, %s1401_s27 }
  0xc8   : > { %v613_v38 = vpop.f32.mrf.mxu1 }
  0xc9   : > { %v1578_v40 = vadd.f32 %v1339_v18, %v613_v38  ;;  %v564_v45 = vpop.f32.mrf.mxu0 }
  0xca   : > { %v1594_v46 = vadd.f32 %v1591_v44, %v564_v45 }
  0xcb   : > { %1291 = vmatmul.msk.f32.gmra.mxu2 %vm622_vm1, %v1578_v40 }
 0x110   : > { %v664_v48 = vpop.f32.mrf.mxu0 }
 0x111   : > { %v665_v49 = vadd.f32 %v1341_v47, %v664_v48 }
 0x113   : > { %v688_v50 = vmax.f32 %v665_v49, 0.0 }
 0x115   : > { %1292 = vmatmul.msk.f32.vlgmr.msrb.gmra.mxu1 %vm622_vm1, %v688_v50 }
 0x118   : > { %v667_v51 = vpop.f32.mrf.mxu0 }
 0x119   : > { %v668_v52 = vadd.f32 %v1341_v47, %v667_v51 }
 0x11b   : > { %v689_v53 = vmax.f32 %v668_v52, 0.0 }
 0x11d   : > { %1293 = vmatmul.msk.f32.gmra.mxu1 %vm622_vm1, %v689_v53 }
 0x120   : > { %v670_v54 = vpop.f32.mrf.mxu0 }
 0x121   : > { %v671_v55 = vadd.f32 %v1341_v47, %v670_v54 }
 0x123   : > { %v690_v56 = vmax.f32 %v671_v55, 0.0 }
 0x125   : > { %1294 = vmatmul.msk.f32.gmra.mxu1 %vm622_vm1, %v690_v56 }
 0x12e   : > { %v673_v57 = vpop.f32.mrf.mxu2 }
 0x12f   : > { %v674_v58 = vadd.f32 %v1341_v47, %v673_v57 }
 0x131   : > { %v691_v59 = vmax.f32 %v674_v58, 0.0 }
 0x133   : > { %1295 = vmatmul.msk.f32.vlgmr.msra.gmra.mxu3 %vm622_vm1, %v691_v59 }
 0x136   : > { %v676_v62 = vpop.f32.mrf.mxu2 }
 0x137   : > { %v677_v63 = vadd.f32 %v1341_v47, %v676_v62 }
 0x139   : > { %v692_v0 = vmax.f32 %v677_v63, 0.0 }
 0x13b   : > { %1296 = vmatmul.msk.f32.gmra.mxu3 %vm622_vm1, %v692_v0 }
 0x13e   : > { %v679_v1 = vpop.f32.mrf.mxu2 }
 0x13f   : > { %v680_v2 = vadd.f32 %v1341_v47, %v679_v1 }
 0x141   : > { %v693_v3 = vmax.f32 %v680_v2, 0.0 }
 0x143   : > { %1297 = vmatmul.msk.f32.gmra.mxu3 %vm622_vm1, %v693_v3 }
 0x146   : > { %v682_v4 = vpop.f32.mrf.mxu2 }
 0x147   : > { %v683_v5 = vadd.f32 %v1341_v47, %v682_v4 }
 0x149   : > { %v694_v6 = vmax.f32 %v683_v5, 0.0 }
 0x14b   : > { %1298 = vmatmul.msk.f32.gmra.mxu3 %vm622_vm1, %v694_v6 }
 0x14e   : > { %v685_v7 = vpop.f32.mrf.mxu2 }
 0x14f   : > { %v686_v8 = vadd.f32 %v1341_v47, %v685_v7  ;;  %v1641_v47 = vld [vmem:[%s1753_s10] ss:$0 sm:$0xff] }
 0x151   : > { %v695_v9 = vmax.f32 %v686_v8, 0.0 }
 0x153   : > { %1299 = vmatmul.msk.f32.gmra.mxu3 %vm622_vm1, %v695_v9 }
 0x192   : > { %v743_v13 = vpop.f32.mrf.mxu1 }
 0x193   : > { %v744_v14 = vadd.f32 %v1342_v12, %v743_v13 }
 0x195   : > { %v767_v15 = vmax.f32 %v744_v14, 0.0 }
 0x197   : > { %1300 = vmatmul.msk.f32.vlgmr.msrb.gmra.mxu2 %vm622_vm1, %v767_v15  ;;  %1316 = vmatmul.msk.f32.vlgmr.msrb.gmra.mxu3 %vm622_vm1, %v767_v15 }
 0x19a   : > { %v746_v16 = vpop.f32.mrf.mxu1 }
 0x19b   : > { %v747_v17 = vadd.f32 %v1342_v12, %v746_v16 }
 0x19d   : > { %v768_v18 = vmax.f32 %v747_v17, 0.0 }
 0x19f   : > { %1301 = vmatmul.msk.f32.gmra.mxu2 %vm622_vm1, %v768_v18  ;;  %1317 = vmatmul.msk.f32.gmra.mxu3 %vm622_vm1, %v768_v18 }
 0x1a2   : > { %v749_v19 = vpop.f32.mrf.mxu1 }
 0x1a3   : > { %v750_v20 = vadd.f32 %v1342_v12, %v749_v19 }
 0x1a5   : > { %v769_v21 = vmax.f32 %v750_v20, 0.0 }
 0x1a7   : > { %1302 = vmatmul.msk.f32.gmra.mxu2 %vm622_vm1, %v769_v21  ;;  %1318 = vmatmul.msk.f32.gmra.mxu3 %vm622_vm1, %v769_v21 }
 0x1b6   : > { %v752_v22 = vpop.f32.mrf.mxu3 }
 0x1b7   : > { %v753_v23 = vadd.f32 %v1342_v12, %v752_v22 }
 0x1b9   : > { %v770_v24 = vmax.f32 %v753_v23, 0.0 }
 0x1bb   : > { %1303 = vmatmul.msk.f32.gmra.mxu2 %vm622_vm1, %v770_v24  ;;  %1319 = vmatmul.msk.f32.gmra.mxu3 %vm622_vm1, %v770_v24 }
 0x1be   : > { %v755_v25 = vpop.f32.mrf.mxu3 }
 0x1bf   : > { %v756_v26 = vadd.f32 %v1342_v12, %v755_v25 }
 0x1c1   : > { %v771_v27 = vmax.f32 %v756_v26, 0.0 }
 0x1c3   : > { %1304 = vmatmul.msk.f32.gmra.mxu2 %vm622_vm1, %v771_v27  ;;  %1320 = vmatmul.msk.f32.gmra.mxu3 %vm622_vm1, %v771_v27 }
 0x1c6   : > { %v758_v28 = vpop.f32.mrf.mxu3 }
 0x1c7   : > { %v759_v30 = vadd.f32 %v1342_v12, %v758_v28 }
 0x1c9   : > { %v772_v31 = vmax.f32 %v759_v30, 0.0 }
 0x1cb   : > { %1305 = vmatmul.msk.f32.gmra.mxu2 %vm622_vm1, %v772_v31  ;;  %1321 = vmatmul.msk.f32.gmra.mxu3 %vm622_vm1, %v772_v31  ;;  %v1651_v31 = vld [vmem:[%s1755_s12] ss:$0 sm:$0xff] }
 0x1ce   : > { %v761_v33 = vpop.f32.mrf.mxu3 }
 0x1cf   : > { %v762_v34 = vadd.f32 %v1342_v12, %v761_v33 }
 0x1d1   : > { %v773_v36 = vmax.f32 %v762_v34, 0.0 }
 0x1d3   : > { %1306 = vmatmul.msk.f32.gmra.mxu2 %vm622_vm1, %v773_v36  ;;  %1322 = vmatmul.msk.f32.gmra.mxu3 %vm622_vm1, %v773_v36 }
 0x1d6   : > { %v764_v37 = vpop.f32.mrf.mxu3 }
 0x1d7   : > { %v765_v38 = vadd.f32 %v1342_v12, %v764_v37 }
 0x1d9   : > { %v774_v45 = vmax.f32 %v765_v38, 0.0  ;;  %v544_v38 = vadd.f32 %v1591_v44, %v1561_v29 }
 0x1db   : > { %1307 = vmatmul.msk.f32.gmra.mxu2 %vm622_vm1, %v774_v45  ;;  %1323 = vmatmul.msk.f32.gmra.mxu3 %vm622_vm1, %v774_v45 }
 0x21a   : > { %v822_v48 = vpop.f32.mrf.mxu2  ;;  %v1037_v22 = vpop.f32.mrf.mxu3 }
 0x21b   : > { %v823_v49 = vadd.f32 %v1641_v47, %v822_v48 }
 0x21d   : > { %v846_v50 = vadd.f32 2.0, %v823_v49 }
 0x21f   : > { %v1308_v51 = vmul.f32 -1.442695, %v846_v50 }
 0x221   : > { %1345 = vpow2.f32 %v1308_v51 }
 0x222   : > { %v825_v52 = vpop.f32.mrf.mxu2 }
 0x223   : > { %v826_v53 = vadd.f32 %v1641_v47, %v825_v52 }
 0x225   : > { %v847_v54 = vadd.f32 2.0, %v826_v53  ;;  %v1038_v53 = vadd.f32 %v1651_v31, %v1037_v22 }
 0x227   : > { %v1346_v55 = vpop.eup %1345  ;;  %v1309_v56 = vmul.f32 -1.442695, %v847_v54 }
 0x228   : > { %v878_v57 = vadd.f32 1.0, %v1346_v55 }
 0x229   : > { %1347 = vpow2.f32 %v1309_v56 }
 0x22a   : > { %1349 = vrcp.f32 %v878_v57  ;;  %v828_v58 = vpop.f32.mrf.mxu2  ;;  %v897_v3 = vand.u32 2147483648, %v878_v57  ;;  %v895_v5 = vand.u32 2147483647, %v878_v57  ;;  %vm891_vm3 = vweird.f32 %v878_v57 }
 0x22b   : > { %v829_v59 = vadd.f32 %v1641_v47, %v828_v58 }
 0x22c   : > { %v898_v9 = vor.u32 1.1754944e-38, %v897_v3  ;;  %vm896_vm5 = vcmp.eq.f32.partialorder %v895_v5, 8.507059e+37  ;;  %v547_v3 = vadd.f32 %v1591_v44, %v1565_v32 }
 0x22d   : > { %v848_v60 = vadd.f32 2.0, %v829_v59 }
 0x22f   : > { %v1348_v61 = vpop.eup %1347  ;;  %v1310_v62 = vmul.f32 -1.442695, %v848_v60  ;;  %v1040_v60 = vpop.f32.mrf.mxu3 }
 0x230   : > { %v1350_v63 = vpop.eup %1349  ;;  %v879_v0 = vadd.f32 1.0, %v1348_v61 }
 0x231   : > { %v887_v1 = vmul.f32 %v1350_v63, %v878_v57  ;;  %1351 = vpow2.f32 %v1310_v62  ;;  %vm892_vm2 = vweird.f32 %v1350_v63  ;;  %v1102_v57 = vpop.permute.xlu0 %1101 }
 0x232   : > { %1353 = vrcp.f32 %v879_v0  ;;  %vm893_vm4 = vmor %vm891_vm3, %vm892_vm2  ;;  %v910_v16 = vand.u32 2147483647, %v879_v0  ;;  %v912_v17 = vand.u32 2147483648, %v879_v0  ;;  %vm906_vm7 = vweird.f32 %v879_v0 }
 0x233   : > { %v888_v2 = vsub.f32 1.0, %v887_v1 }
 0x234   : > { %v913_v26 = vor.u32 1.1754944e-38, %v912_v17  ;;  %vm911_vm9 = vcmp.eq.f32.partialorder %v910_v16, 8.507059e+37 }
 0x235   : > { %v889_v4 = vmul.f32 %v1350_v63, %v888_v2 }
 0x237   : > { %v1352_v6 = vpop.eup %1351  ;;  %v890_v7 = vadd.f32 %v1350_v63, %v889_v4 }
 0x238   : > { %v1354_v8 = vpop.eup %1353  ;;  %v880_v10 = vadd.f32 1.0, %v1352_v6 }
 0x239   : > { %v894_v11 = vsel %vm893_vm4, %v1350_v63, %v890_v7  ;;  %v902_v12 = vmul.f32 %v1354_v8, %v879_v0  ;;  %vm907_vm6 = vweird.f32 %v1354_v8  ;;  %v1104_v32 = vpop.permute.xlu0 %1103 }
 0x23a   : > { %v899_v13 = vsel %vm896_vm5, %v898_v9, %v894_v11  ;;  %1355 = vrcp.f32 %v880_v10  ;;  %vm908_vm8 = vmor %vm906_vm7, %vm907_vm6  ;;  %v925_v45 = vand.u32 2147483647, %v880_v10  ;;  %v927_v48 = vand.u32 2147483648, %v880_v10 }
 0x23b   : > { %v1006_v14 = vadd.f32 1e-07, %v899_v13  ;;  %v903_v15 = vsub.f32 1.0, %v902_v12  ;;  %vm921_vm11 = vweird.f32 %v880_v10 }
 0x23c   : > { %v928_v59 = vor.u32 1.1754944e-38, %v927_v48  ;;  %vm926_vm14 = vcmp.eq.f32.partialorder %v925_v45, 8.507059e+37 }
 0x23d   : > { %v1061_v18 = vmul.f32 1.442695, %v1006_v14  ;;  %v904_v19 = vmul.f32 %v1354_v8, %v903_v15  ;;  %v1134_v20 = vsel %vm622_vm1, %v1006_v14, 0.0  ;;  %v1043_v15 = vpop.f32.mrf.mxu3 }
 0x23e   : > { %v831_v21 = vpop.f32.mrf.mxu2  ;;  %1135 = vadd.xlane.f32.xlu1 %v1134_v20  ;;  %v1044_v22 = vadd.f32 %v1651_v31, %v1043_v15 }
 0x23f   : > { %1357 = vpow2.f32 %v1061_v18  ;;  %v905_v23 = vadd.f32 %v1354_v8, %v904_v19  ;;  %v832_v24 = vadd.f32 %v1641_v47, %v831_v21  ;;  %v550_v18 = vadd.f32 %v1591_v44, %v1569_v35 }
 0x240   : > { %v1356_v25 = vpop.eup %1355 }
 0x241   : > { %v909_v27 = vsel %vm908_vm8, %v1354_v8, %v905_v23  ;;  %v917_v28 = vmul.f32 %v1356_v25, %v880_v10  ;;  %v849_v30 = vadd.f32 2.0, %v832_v24  ;;  %vm922_vm10 = vweird.f32 %v1356_v25 }
 0x242   : > { %v914_v33 = vsel %vm911_vm9, %v913_v26, %v909_v27  ;;  %vm923_vm13 = vmor %vm921_vm11, %vm922_vm10  ;;  %v1041_v8 = vadd.f32 %v1651_v31, %v1040_v60 }
 0x243   : > { %v1007_v34 = vadd.f32 1e-07, %v914_v33  ;;  %v918_v36 = vsub.f32 1.0, %v917_v28  ;;  %v1311_v37 = vmul.f32 -1.442695, %v849_v30 }
 0x245   : > { %v1358_v49 = vpop.eup %1357  ;;  %v1063_v50 = vmul.f32 1.442695, %v1007_v34  ;;  %v919_v51 = vmul.f32 %v1356_v25, %v918_v36  ;;  %1359 = vpow2.f32 %v1311_v37  ;;  %v1137_v52 = vsel %vm622_vm1, %v1007_v34, 0.0  ;;  %v1106_v34 = vpop.permute.xlu1 %1105 }
 0x246   : > { %v1077_v54 = vmul.f32 %v1358_v49, %v544_v38  ;;  %v834_v55 = vpop.f32.mrf.mxu2  ;;  %1138 = vadd.xlane.f32.xlu2 %v1137_v52 }
 0x247   : > { %1361 = vpow2.f32 %v1063_v50  ;;  %v920_v29 = vadd.f32 %v1356_v25, %v919_v51  ;;  %v835_v56 = vadd.f32 %v1641_v47, %v834_v55  ;;  %v1046_v55 = vpop.f32.mrf.mxu3 }
 0x248   : > { %v1085_v58 = vadd.f32 %v1077_v54, %v1038_v53 }
 0x249   : > { %v924_v61 = vsel %vm923_vm13, %v1356_v25, %v920_v29  ;;  %v850_v62 = vadd.f32 2.0, %v835_v56 }
 0x24a   : > { %1093 = vst.msk [vmem:[%s1661_s26] sm:$0xff] %vm622_vm1, %v1085_v58  ;;  %v929_v63 = vsel %vm926_vm14, %v928_v59, %v924_v61 }
 0x24b   : > { %v1360_v0 = vpop.eup %1359  ;;  %1126 = vst.msk [vmem:[%s1661_s26] sm:$0xff] %vm1125_vm12, %v1102_v57  ;;  %v1008_v1 = vadd.f32 1e-07, %v929_v63  ;;  %v1312_v2 = vmul.f32 -1.442695, %v850_v62 }
 0x24c   : > { %v881_v4 = vadd.f32 1.0, %v1360_v0 }
 0x24d   : > { %v1362_v5 = vpop.eup %1361  ;;  %v1065_v6 = vmul.f32 1.442695, %v1008_v1  ;;  %1363 = vpow2.f32 %v1312_v2  ;;  %v1140_v7 = vsel %vm622_vm1, %v1008_v1, 0.0 }
 0x24e   : > { %v1078_v9 = vmul.f32 %v1362_v5, %v547_v3  ;;  %1365 = vrcp.f32 %v881_v4  ;;  %v837_v10 = vpop.f32.mrf.mxu2  ;;  %1141 = vadd.xlane.f32.xlu0 %v1140_v7  ;;  %v942_v28 = vand.u32 2147483648, %v881_v4  ;;  %v940_v33 = vand.u32 2147483647, %v881_v4 }
 0x24f   : > { %1367 = vpow2.f32 %v1065_v6  ;;  %v838_v11 = vadd.f32 %v1641_v47, %v837_v10  ;;  %vm936_vm0 = vweird.f32 %v881_v4 }
 0x250   : > { %v1086_v12 = vadd.f32 %v1078_v9, %v1041_v8  ;;  %v943_v48 = vor.u32 1.1754944e-38, %v942_v28  ;;  %vm941_vm3 = vcmp.eq.f32.partialorder %v940_v33, 8.507059e+37  ;;  %v553_v9 = vadd.f32 %v1591_v44, %v1576_v39 }
 0x251   : > { %v851_v13 = vadd.f32 2.0, %v838_v11 }
 0x252   : > { %1094 = vst.msk [vmem:[%s1661_s26 + $0x8] sm:$0xff] %vm622_vm1, %v1086_v12 }
 0x253   : > { %v1364_v14 = vpop.eup %1363  ;;  %1127 = vst.msk [vmem:[%s1661_s26 + $0x8] sm:$0xff] %vm1125_vm12, %v1104_v32  ;;  %v1313_v16 = vmul.f32 -1.442695, %v851_v13  ;;  %v1049_v13 = vpop.f32.mrf.mxu3 }
 0x254   : > { %v1366_v17 = vpop.eup %1365  ;;  %v882_v19 = vadd.f32 1.0, %v1364_v14 }
 0x255   : > { %v1368_v20 = vpop.eup %1367  ;;  %v932_v21 = vmul.f32 %v1366_v17, %v881_v4  ;;  %1369 = vpow2.f32 %v1313_v16  ;;  %vm937_vm15 = vweird.f32 %v1366_v17  ;;  %v1047_v16 = vadd.f32 %v1651_v31, %v1046_v55 }
 0x256   : > { %v1079_v23 = vmul.f32 %v1368_v20, %v550_v18  ;;  %1371 = vrcp.f32 %v882_v19  ;;  %v840_v24 = vpop.f32.mrf.mxu2  ;;  %vm938_vm2 = vmor %vm936_vm0, %vm937_vm15  ;;  %v955_v57 = vand.u32 2147483647, %v882_v19  ;;  %v957_v58 = vand.u32 2147483648, %v882_v19 }
 0x257   : > { %v933_v25 = vsub.f32 1.0, %v932_v21  ;;  %v841_v26 = vadd.f32 %v1641_v47, %v840_v24  ;;  %vm951_vm5 = vweird.f32 %v882_v19 }
 0x258   : > { %v1087_v27 = vadd.f32 %v1079_v23, %v1044_v22  ;;  %v958_v3 = vor.u32 1.1754944e-38, %v957_v58  ;;  %vm956_vm7 = vcmp.eq.f32.partialorder %v955_v57, 8.507059e+37  ;;  %v559_v58 = vadd.f32 %v1591_v44, %v1584_v42 }
 0x259   : > { %v934_v30 = vmul.f32 %v1366_v17, %v933_v25  ;;  %v852_v35 = vadd.f32 2.0, %v841_v26  ;;  %v1108_v25 = vpop.permute.xlu1 %1107 }
 0x25a   : > { %1095 = vst.msk [vmem:[%s1661_s26 + $0x10] sm:$0xff] %vm622_vm1, %v1087_v27 }
 0x25b   : > { %v1370_v36 = vpop.eup %1369  ;;  %1128 = vst.msk [vmem:[%s1661_s26 + $0x10] sm:$0xff] %vm1125_vm12, %v1106_v34  ;;  %v935_v37 = vadd.f32 %v1366_v17, %v934_v30  ;;  %v1314_v38 = vmul.f32 -1.442695, %v852_v35  ;;  %v556_v30 = vadd.f32 %v1591_v44, %v1582_v41  ;;  %v1110_v41 = vpop.permute.xlu2 %1109 }
 0x25c   : > { %v1372_v45 = vpop.eup %1371  ;;  %v883_v49 = vadd.f32 1.0, %v1370_v36 }
 0x25d   : > { %v939_v50 = vsel %vm938_vm2, %v1366_v17, %v935_v37  ;;  %v947_v51 = vmul.f32 %v1372_v45, %v882_v19  ;;  %1373 = vpow2.f32 %v1314_v38  ;;  %vm952_vm4 = vweird.f32 %v1372_v45 }
 0x25e   : > { %v944_v52 = vsel %vm941_vm3, %v943_v48, %v939_v50  ;;  %1375 = vrcp.f32 %v883_v49  ;;  %v843_v53 = vpop.f32.mrf.mxu2  ;;  %vm953_vm6 = vmor %vm951_vm5, %vm952_vm4  ;;  %v970_v10 = vand.u32 2147483647, %v883_v49  ;;  %v972_v11 = vand.u32 2147483648, %v883_v49 }
 0x25f   : > { %v1009_v54 = vadd.f32 1e-07, %v944_v52  ;;  %v948_v29 = vsub.f32 1.0, %v947_v51  ;;  %v844_v56 = vadd.f32 %v1641_v47, %v843_v53  ;;  %vm966_vm9 = vweird.f32 %v883_v49 }
 0x260   : > { %v973_v21 = vor.u32 1.1754944e-38, %v972_v11  ;;  %vm971_vm11 = vcmp.eq.f32.partialorder %v970_v10, 8.507059e+37 }
 0x261   : > { %v1067_v59 = vmul.f32 1.442695, %v1009_v54  ;;  %v949_v60 = vmul.f32 %v1372_v45, %v948_v29  ;;  %v853_v61 = vadd.f32 2.0, %v844_v56  ;;  %v1143_v62 = vsel %vm622_vm1, %v1009_v54, 0.0 }
 0x262   : > { %1144 = vadd.xlane.f32.xlu2 %v1143_v62 }
 0x263   : > { %v1374_v63 = vpop.eup %1373  ;;  %1377 = vpow2.f32 %v1067_v59  ;;  %v950_v0 = vadd.f32 %v1372_v45, %v949_v60  ;;  %v1315_v1 = vmul.f32 -1.442695, %v853_v61 }
 0x264   : > { %v1376_v2 = vpop.eup %1375  ;;  %v884_v4 = vadd.f32 1.0, %v1374_v63 }
 0x265   : > { %v954_v5 = vsel %vm953_vm6, %v1372_v45, %v950_v0  ;;  %v962_v47 = vmul.f32 %v1376_v2, %v883_v49  ;;  %1379 = vpow2.f32 %v1315_v1  ;;  %vm967_vm8 = vweird.f32 %v1376_v2  ;;  %v1052_v49 = vpop.f32.mrf.mxu3 }
 0x266   : > { %v959_v6 = vsel %vm956_vm7, %v958_v3, %v954_v5  ;;  %1381 = vrcp.f32 %v884_v4  ;;  %vm968_vm10 = vmor %vm966_vm9, %vm967_vm8  ;;  %v985_v33 = vand.u32 2147483647, %v884_v4  ;;  %v987_v35 = vand.u32 2147483648, %v884_v4 }
 0x267   : > { %v1010_v7 = vadd.f32 1e-07, %v959_v6  ;;  %v963_v8 = vsub.f32 1.0, %v962_v47  ;;  %v1050_v45 = vadd.f32 %v1651_v31, %v1049_v13  ;;  %vm981_vm14 = vweird.f32 %v884_v4  ;;  %v1112_v6 = vpop.permute.xlu2 %1111 }
 0x268   : > { %v988_v53 = vor.u32 1.1754944e-38, %v987_v35  ;;  %vm986_vm0 = vcmp.eq.f32.partialorder %v985_v33, 8.507059e+37  ;;  %v1053_v1 = vadd.f32 %v1651_v31, %v1052_v49  ;;  %vm1158_vm6 = vcmask 7168  }
 0x269   : > { %v1378_v12 = vpop.eup %1377  ;;  %v1069_v32 = vmul.f32 1.442695, %v1010_v7  ;;  %v964_v14 = vmul.f32 %v1376_v2, %v963_v8  ;;  %v1146_v15 = vsel %vm622_vm1, %v1010_v7, 0.0 }
 0x26a   : > { %v1080_v17 = vmul.f32 %v1378_v12, %v553_v9  ;;  %1147 = vadd.xlane.f32.xlu1 %v1146_v15  ;;  %v562_v9 = vadd.f32 %v1591_v44, %v1586_v43  ;;  %v1114_v15 = vpop.permute.xlu0 %1113 }
 0x26b   : > { %v1380_v18 = vpop.eup %1379  ;;  %1383 = vpow2.f32 %v1069_v32  ;;  %v965_v19 = vadd.f32 %v1376_v2, %v964_v14 }
 0x26c   : > { %v1382_v39 = vpop.eup %1381  ;;  %v1088_v20 = vadd.f32 %v1080_v17, %v1047_v16  ;;  %v885_v22 = vadd.f32 1.0, %v1380_v18 }
 0x26d   : > { %v969_v23 = vsel %vm968_vm10, %v1376_v2, %v965_v19  ;;  %v977_v24 = vmul.f32 %v1382_v39, %v884_v4  ;;  %vm982_vm13 = vweird.f32 %v1382_v39  ;;  %v1055_v5 = vpop.f32.mrf.mxu3 }
 0x26e   : > { %1096 = vst.msk [vmem:[%s1661_s26 + $0x18] sm:$0xff] %vm622_vm1, %v1088_v20  ;;  %v974_v26 = vsel %vm971_vm11, %v973_v21, %v969_v23  ;;  %1385 = vrcp.f32 %v885_v22  ;;  %vm983_vm15 = vmor %vm981_vm14, %vm982_vm13  ;;  %v1000_v59 = vand.u32 2147483647, %v885_v22  ;;  %v1002_v60 = vand.u32 2147483648, %v885_v22 }
 0x26f   : > { %1129 = vst.msk [vmem:[%s1661_s26 + $0x18] sm:$0xff] %vm1125_vm12, %v1108_v25  ;;  %v1011_v27 = vadd.f32 1e-07, %v974_v26  ;;  %v978_v28 = vsub.f32 1.0, %v977_v24  ;;  %vm996_vm3 = vweird.f32 %v885_v22  ;;  %v1056_v13 = vadd.f32 %v1651_v31, %v1055_v5 }
 0x270   : > { %v1003_v42 = vor.u32 1.1754944e-38, %v1002_v60  ;;  %vm1001_vm5 = vcmp.eq.f32.partialorder %v1000_v59, 8.507059e+37 }
 0x271   : > { %v1384_v34 = vpop.eup %1383  ;;  %v1071_v36 = vmul.f32 1.442695, %v1011_v27  ;;  %v979_v37 = vmul.f32 %v1382_v39, %v978_v28  ;;  %v1149_v38 = vsel %vm622_vm1, %v1011_v27, 0.0 }
 0x272   : > { %v1081_v48 = vmul.f32 %v1384_v34, %v556_v30  ;;  %1150 = vadd.xlane.f32.xlu2 %v1149_v38 }
 0x273   : > { %1387 = vpow2.f32 %v1071_v36  ;;  %v980_v50 = vadd.f32 %v1382_v39, %v979_v37 }
 0x274   : > { %v1386_v51 = vpop.eup %1385  ;;  %v1089_v52 = vadd.f32 %v1081_v48, %v1050_v45 }
 0x275   : > { %v984_v54 = vsel %vm983_vm15, %v1382_v39, %v980_v50  ;;  %v992_v55 = vmul.f32 %v1386_v51, %v885_v22  ;;  %vm997_vm2 = vweird.f32 %v1386_v51  ;;  %v1058_v16 = vpop.f32.mrf.mxu3 }
 0x276   : > { %1097 = vst.msk [vmem:[%s1661_s26 + $0x20] sm:$0xff] %vm622_vm1, %v1089_v52  ;;  %v989_v29 = vsel %vm986_vm0, %v988_v53, %v984_v54  ;;  %vm998_vm4 = vmor %vm996_vm3, %vm997_vm2  ;;  %v1059_v43 = vadd.f32 %v1651_v31, %v1058_v16 }
 0x277   : > { %1130 = vst.msk [vmem:[%s1661_s26 + $0x20] sm:$0xff] %vm1125_vm12, %v1110_v41  ;;  %v1012_v56 = vadd.f32 1e-07, %v989_v29  ;;  %v993_v57 = vsub.f32 1.0, %v992_v55 }
 0x279   : > { %v1388_v61 = vpop.eup %1387  ;;  %v1073_v62 = vmul.f32 1.442695, %v1012_v56  ;;  %v994_v63 = vmul.f32 %v1386_v51, %v993_v57  ;;  %v1152_v0 = vsel %vm622_vm1, %v1012_v56, 0.0 }
 0x27a   : > { %v1082_v2 = vmul.f32 %v1388_v61, %v559_v58  ;;  %1153 = vadd.xlane.f32.xlu0 %v1152_v0 }
 0x27b   : > { %1389 = vpow2.f32 %v1073_v62  ;;  %v995_v3 = vadd.f32 %v1386_v51, %v994_v63 }
 0x27c   : > { %v1090_v4 = vadd.f32 %v1082_v2, %v1053_v1 }
 0x27d   : > { %v999_v47 = vsel %vm998_vm4, %v1386_v51, %v995_v3 }
 0x27e   : > { %1098 = vst.msk [vmem:[%s1661_s26 + $0x28] sm:$0xff] %vm622_vm1, %v1090_v4  ;;  %v1004_v7 = vsel %vm1001_vm5, %v1003_v42, %v999_v47 }
 0x27f   : > { %1131 = vst.msk [vmem:[%s1661_s26 + $0x28] sm:$0xff] %vm1125_vm12, %v1112_v6  ;;  %v1013_v8 = vadd.f32 1e-07, %v1004_v7 }
 0x281   : > { %v1390_v10 = vpop.eup %1389  ;;  %v1075_v11 = vmul.f32 1.442695, %v1013_v8  ;;  %v1155_v12 = vsel %vm622_vm1, %v1013_v8, 0.0 }
 0x282   : > { %v1083_v32 = vmul.f32 %v1390_v10, %v562_v9  ;;  %1156 = vadd.xlane.f32.xlu1 %v1155_v12 }
 0x283   : > { %1391 = vpow2.f32 %v1075_v11 }
 0x284   : > { %v1091_v14 = vadd.f32 %v1083_v32, %v1056_v13 }
 0x286   : > { %1099 = vst.msk [vmem:[%s1661_s26 + $0x30] sm:$0xff] %vm622_vm1, %v1091_v14 }
 0x287   : > { %1132 = vst.msk [vmem:[%s1661_s26 + $0x30] sm:$0xff] %vm1125_vm12, %v1114_v15 }
 0x289   : > { %v1392_v17 = vpop.eup %1391 }
 0x28a   : > { %v1084_v44 = vmul.f32 %v1392_v17, %v1594_v46  ;;  %1115 = vrot.lane.b32.xlu2 %v1578_v40, %s1401_s27 }
 0x28c   : > { %v1092_v18 = vadd.f32 %v1084_v44, %v1059_v43 }
 0x28e   : > { %1100 = vst.msk [vmem:[%s1661_s26 + $0x38] sm:$0xff] %vm622_vm1, %v1092_v18 }
 0x2b1   : > { %v1136_v19 = vpop.xlane.xlu1 %1135 }
 0x2b2   : > { %1159 = vst.msk [vmem:[%s483_s15] sm:$0xff] %vm1158_vm6, %v1136_v19 }
 0x2b9   : > { %v1139_v39 = vpop.xlane.xlu2 %1138 }
 0x2ba   : > { %1160 = vst.msk [vmem:[%s483_s15 + $0x8] sm:$0xff] %vm1158_vm6, %v1139_v39 }
 0x2c1   : > { %v1142_v31 = vpop.xlane.xlu0 %1141 }
 0x2c2   : > { %1161 = vst.msk [vmem:[%s483_s15 + $0x10] sm:$0xff] %vm1158_vm6, %v1142_v31 }
 0x2d5   : > { %v1145_v46 = vpop.xlane.xlu2 %1144 }
 0x2d6   : > { %1162 = vst.msk [vmem:[%s483_s15 + $0x18] sm:$0xff] %vm1158_vm6, %v1145_v46 }
 0x2dd   : > { %v1148_v40 = vpop.xlane.xlu1 %1147 }
 0x2de   : > { %1163 = vst.msk [vmem:[%s483_s15 + $0x20] sm:$0xff] %vm1158_vm6, %v1148_v40 }
 0x2e5   : > { %v1151_v20 = vpop.xlane.xlu2 %1150 }
 0x2e6   : > { %1164 = vst.msk [vmem:[%s483_s15 + $0x28] sm:$0xff] %vm1158_vm6, %v1151_v20 }
 0x2ed   : > { %v1154_v21 = vpop.xlane.xlu0 %1153  ;;  %v1116_v22 = vpop.permute.xlu2 %1115 }
 0x2ee   : > { %1165 = vst.msk [vmem:[%s483_s15 + $0x30] sm:$0xff] %vm1158_vm6, %v1154_v21 }
 0x2ef   : > { %1133 = vst.msk [vmem:[%s1661_s26 + $0x38] sm:$0xff] %vm1125_vm12, %v1116_v22 }
 0x2f5   : > { %v1157_v23 = vpop.xlane.xlu1 %1156 }
 0x2f6   : > { %1166 = vst.msk [vmem:[%s483_s15 + $0x38] sm:$0xff] %vm1158_vm6, %v1157_v23 }
 0x2f7 PF: > { %s25_s29 = sadd.s32 1, %s1399_s29  }
 0x2f8   : > { %p22_p4 = scmp.ge.s32.totalorder %s25_s29, 6  }
 0x2fa   :  { %24 = sbr.rel (!%p22_p4) target bundleno = 1 (0x1), region = 114 }

</bundles_post_ra>
